<compile_context>
chip_gen: v7x
topology: tpu7x:2x2x1
jax: 0.10.0
libtpu: 0.0.40
codegen_flags: <defaults>
</compile_context>

<pallas_src>
import functools

import jax
import jax.numpy as jnp
from jax import lax
from jax.experimental import pallas as pl
from jax.experimental.pallas import tpu as pltpu

EPS = 1e-5
LANE = 128                      # output columns padded to a multiple of this
TM_MAX = 512                    # max row tile of the im2col matmul (rows = N*Ho*Wo)
VMEM_LIMIT = 32 * 1024 * 1024   # explicit scoped-VMEM budget (safe on v5e/v6e/v7x)


def _round_up(v, m):
    return ((v + m - 1) // m) * m


# ----------------------------- Pallas kernels -------------------------------
def _matmul_bias_kernel(p_ref, w_ref, b_ref, o_ref, *, relu):
    # bf16 x bf16 -> f32 accumulate on the MXU; affine epilogue in f32 on VPU.
    acc = jnp.dot(p_ref[...], w_ref[...], preferred_element_type=jnp.float32)
    y = acc + b_ref[...]
    if relu:
        y = jnp.maximum(y, 0.0)
    o_ref[...] = y.astype(o_ref.dtype)


def _matmul_bias_res_kernel(p_ref, w_ref, b_ref, r_ref, o_ref, *, relu):
    acc = jnp.dot(p_ref[...], w_ref[...], preferred_element_type=jnp.float32)
    y = acc + b_ref[...] + r_ref[...]
    if relu:
        y = jnp.maximum(y, 0.0)
    o_ref[...] = y.astype(o_ref.dtype)


def fused_conv_bn(patches, w_mat, scale, bias, residual=None, *, relu):
    """act((patches @ (w_mat * bn_scale)) + bn_bias [+ residual]) via Pallas."""
    M, Kd = patches.shape
    Cout = w_mat.shape[1]
    Cp = _round_up(Cout, LANE)                  # lane-dense output columns

    # Fold eval-mode BN scale into weight columns; zero-pad to Cp lanes; bf16.
    w_f = w_mat.astype(jnp.float32) * scale.astype(jnp.float32)[None, :]
    w_bf = jnp.pad(w_f, ((0, 0), (0, Cp - Cout))).astype(jnp.bfloat16)
    b2 = jnp.pad(bias.reshape(1, Cout).astype(jnp.float32),
                 ((0, 0), (0, Cp - Cout)))
    p_bf = patches.astype(jnp.bfloat16)         # bf16 MXU operand (halves DMA)

    tm = min(TM_MAX, _round_up(M, 8))
    grid = (pl.cdiv(M, tm),)

    in_specs = [
        pl.BlockSpec((tm, Kd), lambda i: (i, 0)),   # patches tile (bf16)
        pl.BlockSpec((Kd, Cp), lambda i: (0, 0)),   # folded weight (bf16)
        pl.BlockSpec((1, Cp), lambda i: (0, 0)),    # bn bias (f32)
    ]
    args = [p_bf, w_bf, b2]
    if residual is not None:
        r2 = jnp.pad(residual.astype(jnp.float32), ((0, 0), (0, Cp - Cout)))
        in_specs.append(pl.BlockSpec((tm, Cp), lambda i: (i, 0)))
        args.append(r2)
        kernel = functools.partial(_matmul_bias_res_kernel, relu=relu)
    else:
        kernel = functools.partial(_matmul_bias_kernel, relu=relu)

    # TODO(synk): for ResNet-scale channels add a K-reduction / Cout grid axis
    #             (f32 acc scratch + pl.when) so the full weight never has to
    #             fit VMEM (matters on v7x's 64 MiB).
    out = pl.pallas_call(
        kernel,
        out_shape=jax.ShapeDtypeStruct((M, Cp), jnp.float32),
        grid=grid,
        in_specs=in_specs,
        out_specs=pl.BlockSpec((tm, Cp), lambda i: (i, 0)),
        compiler_params=pltpu.CompilerParams(
            dimension_semantics=("parallel",),
            vmem_limit_bytes=VMEM_LIMIT),
    )(*args)
    return out[:, :Cout]


# ------------------------------- JAX glue -----------------------------------
def im2col(x, k, stride):
    """x: (N, H, W, C) -> (N*Ho*Wo, k*k*C) with PyTorch-style padding k//2."""
    pad = k // 2
    xp = jnp.pad(x, ((0, 0), (pad, pad), (pad, pad), (0, 0)))
    N, Hp, Wp, C = xp.shape
    Ho = (Hp - k) // stride + 1
    Wo = (Wp - k) // stride + 1
    taps = []
    for dy in range(k):
        for dx in range(k):
            taps.append(xp[:, dy:dy + stride * Ho:stride,
                           dx:dx + stride * Wo:stride, :])
    p = jnp.stack(taps, axis=3)  # (N, Ho, Wo, k*k, C)
    return p.reshape(N * Ho * Wo, k * k * C), (N, Ho, Wo)


def conv_w_to_mat(w):
    """(Cout, Cin, kH, kW) -> (kH*kW*Cin, Cout), matching im2col tap ordering."""
    Cout, Cin, kH, kW = w.shape
    return jnp.transpose(w, (2, 3, 1, 0)).reshape(kH * kW * Cin, Cout)


def bn_scale_bias(bn):
    gamma, beta, mean, var = bn
    scale = gamma / jnp.sqrt(var + EPS)
    bias = beta - mean * scale
    return scale, bias


# ---------------------------- parameter setup -------------------------------
def init_bn(key, c):
    k1, k2, k3, k4 = jax.random.split(key, 4)
    gamma = 1.0 + 0.1 * jax.random.normal(k1, (c,), jnp.float32)
    beta = 0.1 * jax.random.normal(k2, (c,), jnp.float32)
    mean = 0.1 * jax.random.normal(k3, (c,), jnp.float32)
    var = jnp.abs(jax.random.normal(k4, (c,), jnp.float32)) + 0.5
    return gamma, beta, mean, var


def init_basic_block(key, cin, cout, k, stride):
    keys = jax.random.split(key, 6)
    w1 = 0.1 * jax.random.normal(keys[0], (cout, cin, k, k), jnp.float32)
    bn1 = init_bn(keys[1], cout)
    w2 = 0.1 * jax.random.normal(keys[2], (cout, cout, k, k), jnp.float32)
    bn2 = init_bn(keys[3], cout)
    has_sc = (stride != 1) or (cin != cout)
    if has_sc:
        ws = 0.1 * jax.random.normal(keys[4], (cout, cin, 1, 1), jnp.float32)
        bns = init_bn(keys[5], cout)
    else:
        ws, bns = None, None
    return dict(w1=w1, bn1=bn1, w2=w2, bn2=bn2, ws=ws, bns=bns,
                k=k, stride=stride, has_sc=has_sc, cin=cin, cout=cout)


# ------------------------------ forward pass --------------------------------
def basic_block_forward(x, p):  # x: NHWC
    k, stride, cout = p['k'], p['stride'], p['cout']

    # conv1 -> bn1 -> relu
    pat1, (n, ho, wo) = im2col(x, k, stride)
    s1, b1 = bn_scale_bias(p['bn1'])
    y1 = fused_conv_bn(pat1, conv_w_to_mat(p['w1']), s1, b1, relu=True)
    y1_img = y1.reshape(n, ho, wo, cout)

    # shortcut branch
    if p['has_sc']:
        pats, _ = im2col(x, 1, stride)
        ss, bs = bn_scale_bias(p['bns'])
        sc = fused_conv_bn(pats, conv_w_to_mat(p['ws']), ss, bs, relu=False)
    else:
        # identity shortcut: valid because has_sc==False => stride==1, cin==cout
        sc = x.reshape(-1, cout)

    # conv2 -> bn2 -> (+shortcut) -> relu   (single fused kernel call)
    pat2, _ = im2col(y1_img, k, 1)
    s2, b2 = bn_scale_bias(p['bn2'])
    out = fused_conv_bn(pat2, conv_w_to_mat(p['w2']), s2, b2, sc, relu=True)
    return out.reshape(n, ho, wo, cout)


def cand_basic_block_forward(x_nchw, blocks):
    x = jnp.transpose(x_nchw, (0, 2, 3, 1))  # NCHW -> NHWC
    for p in blocks:
        x = basic_block_forward(x, p)
    return jnp.transpose(x, (0, 3, 1, 2))    # NHWC -> NCHW


# --------------------------- pure-JAX reference -----------------------------
def _ref_conv(x, w, stride, pad):
    return lax.conv_general_dilated(
        x, jnp.transpose(w, (2, 3, 1, 0)),
        window_strides=(stride, stride),
        padding=[(pad, pad), (pad, pad)],
        dimension_numbers=('NHWC', 'HWIO', 'NHWC'),
        precision=lax.Precision.HIGHEST)


def _ref_bn(x, bn):
    gamma, beta, mean, var = bn
    return (x - mean) / jnp.sqrt(var + EPS) * gamma + beta


def _ref_basic_block(x, p):
    k, stride = p['k'], p['stride']
    pad = k // 2
    y = jax.nn.relu(_ref_bn(_ref_conv(x, p['w1'], stride, pad), p['bn1']))
    y = _ref_bn(_ref_conv(y, p['w2'], 1, pad), p['bn2'])
    sc = _ref_bn(_ref_conv(x, p['ws'], stride, 0), p['bns']) if p['has_sc'] else x
    return jax.nn.relu(y + sc)


# ---------------------------------- main -------------------------------------
if __name__ == "__main__":
    key = jax.random.PRNGKey(0)
    kx, kp = jax.random.split(key)

    in_channels, out_channels, ksize, stride, num_conv = 4, 8, 3, 2, 2
    x = jax.random.normal(kx, (2, in_channels, 16, 16), jnp.float32)

    bkeys = jax.random.split(kp, num_conv)
    blocks = [init_basic_block(bkeys[i],
                               in_channels if i == 0 else out_channels,
                               out_channels, ksize,
                               stride if i == 0 else 1)
              for i in range(num_conv)]

    fwd = jax.jit(lambda xin: cand_basic_block_forward(xin, blocks))
    out = jax.block_until_ready(fwd(x))

    # correctness check against a pure-JAX f32 reference (kernel is bf16 MXU,
    # f32 accumulate -> tolerance relaxed accordingly)
    xr = jnp.transpose(x, (0, 2, 3, 1))
    for p in blocks:
        xr = _ref_basic_block(xr, p)
    ref = jnp.transpose(xr, (0, 3, 1, 2))

    assert out.shape == ref.shape, (out.shape, ref.shape)
    err = float(jnp.max(jnp.abs(out - ref)))
    assert err < 5e-2, f"max abs error too large: {err}"
    print("KERNEL_OK")
</pallas_src>

<mosaic_0001>
module attributes {stable_mosaic.version = 11 : i64} {
  func.func @_matmul_bias_kernel(%arg0: i32, %arg1: memref<128x4xbf16, #tpu.memory_space<vmem>>, %arg2: memref<4x128xbf16, #tpu.memory_space<vmem>>, %arg3: memref<1x128xf32, #tpu.memory_space<vmem>>, %arg4: memref<128x128xf32, #tpu.memory_space<vmem>>) attributes {dimension_semantics = [#tpu.dimension_semantics<parallel>], iteration_bounds = array<i64: 1>, scalar_prefetch = 0 : i64, scratch_operands = 0 : i64, tpu.core_type = #tpu.core_type<tc>, window_params = [{transform_indices = @transform_0, window_bounds = array<i64: 128, 4>}, {pipeline_mode = #tpu.pipeline_mode<synchronous>, transform_indices = @transform_1, window_bounds = array<i64: 4, 128>}, {pipeline_mode = #tpu.pipeline_mode<synchronous>, transform_indices = @transform_2, window_bounds = array<i64: 1, 128>}, {transform_indices = @transform_3, window_bounds = array<i64: 128, 128>}]} {
    %c0 = arith.constant 0 : index
    %c0_0 = arith.constant 0 : index
    %0 = vector.load %arg1[%c0, %c0_0] : memref<128x4xbf16, #tpu.memory_space<vmem>>, vector<128x4xbf16>
    %c0_1 = arith.constant 0 : index
    %c0_2 = arith.constant 0 : index
    %1 = vector.load %arg2[%c0_1, %c0_2] : memref<4x128xbf16, #tpu.memory_space<vmem>>, vector<4x128xbf16>
    %cst = arith.constant dense<0.000000e+00> : vector<128x128xf32>
    %2 = tpu.matmul %0, %1, %cst {dimension_numbers = #tpu.dot_dimension_numbers<[1], [0], [0], [1], [0, 0, 1, 1], [], []>} : vector<128x4xbf16>, vector<4x128xbf16>, vector<128x128xf32> -> vector<128x128xf32>
    %c0_3 = arith.constant 0 : index
    %c0_4 = arith.constant 0 : index
    %3 = vector.load %arg3[%c0_3, %c0_4] : memref<1x128xf32, #tpu.memory_space<vmem>>, vector<1x128xf32>
    %4 = vector.broadcast %3 : vector<1x128xf32> to vector<128x128xf32>
    %5 = arith.addf %2, %4 : vector<128x128xf32>
    %c0_5 = arith.constant 0 : index
    %c0_6 = arith.constant 0 : index
    %6 = vector.load %arg4[%c0_5, %c0_6] : memref<128x128xf32, #tpu.memory_space<vmem>>, vector<128x128xf32>
    tpu.vector_store %arg4[%c0_5, %c0_6], %5 {strides = array<i32>} : memref<128x128xf32, #tpu.memory_space<vmem>>, vector<128x128xf32>,
    return
  }
  func.func @transform_0(%arg0: i32) -> (i32, i32) {
    %c0_i32 = arith.constant 0 : i32
    %c0_i32_0 = arith.constant 0 : i32
    return %arg0, %c0_i32 : i32, i32
  }
  func.func @transform_1(%arg0: i32) -> (i32, i32) {
    %c0_i32 = arith.constant 0 : i32
    %c0_i32_0 = arith.constant 0 : i32
    %c0_i32_1 = arith.constant 0 : i32
    return %c0_i32, %c0_i32_0 : i32, i32
  }
  func.func @transform_2(%arg0: i32) -> (i32, i32) {
    %c0_i32 = arith.constant 0 : i32
    %c0_i32_0 = arith.constant 0 : i32
    %c0_i32_1 = arith.constant 0 : i32
    return %c0_i32, %c0_i32_0 : i32, i32
  }
  func.func @transform_3(%arg0: i32) -> (i32, i32) {
    %c0_i32 = arith.constant 0 : i32
    %c0_i32_0 = arith.constant 0 : i32
    return %arg0, %c0_i32 : i32, i32
  }
}

module attributes {stable_mosaic.version = 11 : i64} {
  func.func @_matmul_bias_kernel(%arg0: i32, %arg1: memref<128x36xbf16, #tpu.memory_space<vmem>>, %arg2: memref<36x128xbf16, #tpu.memory_space<vmem>>, %arg3: memref<1x128xf32, #tpu.memory_space<vmem>>, %arg4: memref<128x128xf32, #tpu.memory_space<vmem>>) attributes {dimension_semantics = [#tpu.dimension_semantics<parallel>], iteration_bounds = array<i64: 1>, scalar_prefetch = 0 : i64, scratch_operands = 0 : i64, tpu.core_type = #tpu.core_type<tc>, window_params = [{transform_indices = @transform_0, window_bounds = array<i64: 128, 36>}, {pipeline_mode = #tpu.pipeline_mode<synchronous>, transform_indices = @transform_1, window_bounds = array<i64: 36, 128>}, {pipeline_mode = #tpu.pipeline_mode<synchronous>, transform_indices = @transform_2, window_bounds = array<i64: 1, 128>}, {transform_indices = @transform_3, window_bounds = array<i64: 128, 128>}]} {
    %c0 = arith.constant 0 : index
    %c0_0 = arith.constant 0 : index
    %0 = vector.load %arg1[%c0, %c0_0] : memref<128x36xbf16, #tpu.memory_space<vmem>>, vector<128x36xbf16>
    %c0_1 = arith.constant 0 : index
    %c0_2 = arith.constant 0 : index
    %1 = vector.load %arg2[%c0_1, %c0_2] : memref<36x128xbf16, #tpu.memory_space<vmem>>, vector<36x128xbf16>
    %cst = arith.constant dense<0.000000e+00> : vector<128x128xf32>
    %2 = tpu.matmul %0, %1, %cst {dimension_numbers = #tpu.dot_dimension_numbers<[1], [0], [0], [1], [0, 0, 1, 1], [], []>} : vector<128x36xbf16>, vector<36x128xbf16>, vector<128x128xf32> -> vector<128x128xf32>
    %c0_3 = arith.constant 0 : index
    %c0_4 = arith.constant 0 : index
    %3 = vector.load %arg3[%c0_3, %c0_4] : memref<1x128xf32, #tpu.memory_space<vmem>>, vector<1x128xf32>
    %4 = vector.broadcast %3 : vector<1x128xf32> to vector<128x128xf32>
    %5 = arith.addf %2, %4 : vector<128x128xf32>
    %cst_5 = arith.constant 0.000000e+00 : f32
    %6 = vector.broadcast %cst_5 : f32 to vector<128x128xf32>
    %7 = arith.maximumf %5, %6 : vector<128x128xf32>
    %c0_6 = arith.constant 0 : index
    %c0_7 = arith.constant 0 : index
    %8 = vector.load %arg4[%c0_6, %c0_7] : memref<128x128xf32, #tpu.memory_space<vmem>>, vector<128x128xf32>
    tpu.vector_store %arg4[%c0_6, %c0_7], %7 {strides = array<i32>} : memref<128x128xf32, #tpu.memory_space<vmem>>, vector<128x128xf32>,
    return
  }
  func.func @transform_0(%arg0: i32) -> (i32, i32) {
    %c0_i32 = arith.constant 0 : i32
    %c0_i32_0 = arith.constant 0 : i32
    return %arg0, %c0_i32 : i32, i32
  }
  func.func @transform_1(%arg0: i32) -> (i32, i32) {
    %c0_i32 = arith.constant 0 : i32
    %c0_i32_0 = arith.constant 0 : i32
    %c0_i32_1 = arith.constant 0 : i32
    return %c0_i32, %c0_i32_0 : i32, i32
  }
  func.func @transform_2(%arg0: i32) -> (i32, i32) {
    %c0_i32 = arith.constant 0 : i32
    %c0_i32_0 = arith.constant 0 : i32
    %c0_i32_1 = arith.constant 0 : i32
    return %c0_i32, %c0_i32_0 : i32, i32
  }
  func.func @transform_3(%arg0: i32) -> (i32, i32) {
    %c0_i32 = arith.constant 0 : i32
    %c0_i32_0 = arith.constant 0 : i32
    return %arg0, %c0_i32 : i32, i32
  }
}

module attributes {stable_mosaic.version = 11 : i64} {
  func.func @_matmul_bias_res_kernel(%arg0: i32, %arg1: memref<128x72xbf16, #tpu.memory_space<vmem>>, %arg2: memref<72x128xbf16, #tpu.memory_space<vmem>>, %arg3: memref<1x128xf32, #tpu.memory_space<vmem>>, %arg4: memref<128x128xf32, #tpu.memory_space<vmem>>, %arg5: memref<128x128xf32, #tpu.memory_space<vmem>>) attributes {dimension_semantics = [#tpu.dimension_semantics<parallel>], iteration_bounds = array<i64: 1>, scalar_prefetch = 0 : i64, scratch_operands = 0 : i64, tpu.core_type = #tpu.core_type<tc>, window_params = [{transform_indices = @transform_0, window_bounds = array<i64: 128, 72>}, {pipeline_mode = #tpu.pipeline_mode<synchronous>, transform_indices = @transform_1, window_bounds = array<i64: 72, 128>}, {pipeline_mode = #tpu.pipeline_mode<synchronous>, transform_indices = @transform_2, window_bounds = array<i64: 1, 128>}, {transform_indices = @transform_3, window_bounds = array<i64: 128, 128>}, {transform_indices = @transform_4, window_bounds = array<i64: 128, 128>}]} {
    %c0 = arith.constant 0 : index
    %c0_0 = arith.constant 0 : index
    %0 = vector.load %arg1[%c0, %c0_0] : memref<128x72xbf16, #tpu.memory_space<vmem>>, vector<128x72xbf16>
    %c0_1 = arith.constant 0 : index
    %c0_2 = arith.constant 0 : index
    %1 = vector.load %arg2[%c0_1, %c0_2] : memref<72x128xbf16, #tpu.memory_space<vmem>>, vector<72x128xbf16>
    %cst = arith.constant dense<0.000000e+00> : vector<128x128xf32>
    %2 = tpu.matmul %0, %1, %cst {dimension_numbers = #tpu.dot_dimension_numbers<[1], [0], [0], [1], [0, 0, 1, 1], [], []>} : vector<128x72xbf16>, vector<72x128xbf16>, vector<128x128xf32> -> vector<128x128xf32>
    %c0_3 = arith.constant 0 : index
    %c0_4 = arith.constant 0 : index
    %3 = vector.load %arg3[%c0_3, %c0_4] : memref<1x128xf32, #tpu.memory_space<vmem>>, vector<1x128xf32>
    %4 = vector.broadcast %3 : vector<1x128xf32> to vector<128x128xf32>
    %5 = arith.addf %2, %4 : vector<128x128xf32>
    %c0_5 = arith.constant 0 : index
    %c0_6 = arith.constant 0 : index
    %6 = vector.load %arg4[%c0_5, %c0_6] : memref<128x128xf32, #tpu.memory_space<vmem>>, vector<128x128xf32>
    %7 = arith.addf %5, %6 : vector<128x128xf32>
    %cst_7 = arith.constant 0.000000e+00 : f32
    %8 = vector.broadcast %cst_7 : f32 to vector<128x128xf32>
    %9 = arith.maximumf %7, %8 : vector<128x128xf32>
    %c0_8 = arith.constant 0 : index
    %c0_9 = arith.constant 0 : index
    %10 = vector.load %arg5[%c0_8, %c0_9] : memref<128x128xf32, #tpu.memory_space<vmem>>, vector<128x128xf32>
    tpu.vector_store %arg5[%c0_8, %c0_9], %9 {strides = array<i32>} : memref<128x128xf32, #tpu.memory_space<vmem>>, vector<128x128xf32>,
    return
  }
  func.func @transform_0(%arg0: i32) -> (i32, i32) {
    %c0_i32 = arith.constant 0 : i32
    %c0_i32_0 = arith.constant 0 : i32
    return %arg0, %c0_i32 : i32, i32
  }
  func.func @transform_1(%arg0: i32) -> (i32, i32) {
    %c0_i32 = arith.constant 0 : i32
    %c0_i32_0 = arith.constant 0 : i32
    %c0_i32_1 = arith.constant 0 : i32
    return %c0_i32, %c0_i32_0 : i32, i32
  }
  func.func @transform_2(%arg0: i32) -> (i32, i32) {
    %c0_i32 = arith.constant 0 : i32
    %c0_i32_0 = arith.constant 0 : i32
    %c0_i32_1 = arith.constant 0 : i32
    return %c0_i32, %c0_i32_0 : i32, i32
  }
  func.func @transform_3(%arg0: i32) -> (i32, i32) {
    %c0_i32 = arith.constant 0 : i32
    %c0_i32_0 = arith.constant 0 : i32
    return %arg0, %c0_i32 : i32, i32
  }
  func.func @transform_4(%arg0: i32) -> (i32, i32) {
    %c0_i32 = arith.constant 0 : i32
    %c0_i32_0 = arith.constant 0 : i32
    return %arg0, %c0_i32 : i32, i32
  }
}

module attributes {stable_mosaic.version = 11 : i64} {
  func.func @_matmul_bias_kernel(%arg0: i32, %arg1: memref<128x72xbf16, #tpu.memory_space<vmem>>, %arg2: memref<72x128xbf16, #tpu.memory_space<vmem>>, %arg3: memref<1x128xf32, #tpu.memory_space<vmem>>, %arg4: memref<128x128xf32, #tpu.memory_space<vmem>>) attributes {dimension_semantics = [#tpu.dimension_semantics<parallel>], iteration_bounds = array<i64: 1>, scalar_prefetch = 0 : i64, scratch_operands = 0 : i64, tpu.core_type = #tpu.core_type<tc>, window_params = [{transform_indices = @transform_0, window_bounds = array<i64: 128, 72>}, {pipeline_mode = #tpu.pipeline_mode<synchronous>, transform_indices = @transform_1, window_bounds = array<i64: 72, 128>}, {pipeline_mode = #tpu.pipeline_mode<synchronous>, transform_indices = @transform_2, window_bounds = array<i64: 1, 128>}, {transform_indices = @transform_3, window_bounds = array<i64: 128, 128>}]} {
    %c0 = arith.constant 0 : index
    %c0_0 = arith.constant 0 : index
    %0 = vector.load %arg1[%c0, %c0_0] : memref<128x72xbf16, #tpu.memory_space<vmem>>, vector<128x72xbf16>
    %c0_1 = arith.constant 0 : index
    %c0_2 = arith.constant 0 : index
    %1 = vector.load %arg2[%c0_1, %c0_2] : memref<72x128xbf16, #tpu.memory_space<vmem>>, vector<72x128xbf16>
    %cst = arith.constant dense<0.000000e+00> : vector<128x128xf32>
    %2 = tpu.matmul %0, %1, %cst {dimension_numbers = #tpu.dot_dimension_numbers<[1], [0], [0], [1], [0, 0, 1, 1], [], []>} : vector<128x72xbf16>, vector<72x128xbf16>, vector<128x128xf32> -> vector<128x128xf32>
    %c0_3 = arith.constant 0 : index
    %c0_4 = arith.constant 0 : index
    %3 = vector.load %arg3[%c0_3, %c0_4] : memref<1x128xf32, #tpu.memory_space<vmem>>, vector<1x128xf32>
    %4 = vector.broadcast %3 : vector<1x128xf32> to vector<128x128xf32>
    %5 = arith.addf %2, %4 : vector<128x128xf32>
    %cst_5 = arith.constant 0.000000e+00 : f32
    %6 = vector.broadcast %cst_5 : f32 to vector<128x128xf32>
    %7 = arith.maximumf %5, %6 : vector<128x128xf32>
    %c0_6 = arith.constant 0 : index
    %c0_7 = arith.constant 0 : index
    %8 = vector.load %arg4[%c0_6, %c0_7] : memref<128x128xf32, #tpu.memory_space<vmem>>, vector<128x128xf32>
    tpu.vector_store %arg4[%c0_6, %c0_7], %7 {strides = array<i32>} : memref<128x128xf32, #tpu.memory_space<vmem>>, vector<128x128xf32>,
    return
  }
  func.func @transform_0(%arg0: i32) -> (i32, i32) {
    %c0_i32 = arith.constant 0 : i32
    %c0_i32_0 = arith.constant 0 : i32
    return %arg0, %c0_i32 : i32, i32
  }
  func.func @transform_1(%arg0: i32) -> (i32, i32) {
    %c0_i32 = arith.constant 0 : i32
    %c0_i32_0 = arith.constant 0 : i32
    %c0_i32_1 = arith.constant 0 : i32
    return %c0_i32, %c0_i32_0 : i32, i32
  }
  func.func @transform_2(%arg0: i32) -> (i32, i32) {
    %c0_i32 = arith.constant 0 : i32
    %c0_i32_0 = arith.constant 0 : i32
    %c0_i32_1 = arith.constant 0 : i32
    return %c0_i32, %c0_i32_0 : i32, i32
  }
  func.func @transform_3(%arg0: i32) -> (i32, i32) {
    %c0_i32 = arith.constant 0 : i32
    %c0_i32_0 = arith.constant 0 : i32
    return %arg0, %c0_i32 : i32, i32
  }
}

</mosaic_0001>

<bundles_post_ra>
// kernel: _lambda_.6
= control target key start
LH: loop header
LB: loop body
LE: loop exit
PB: predicated region body
PF: predicated region fallthrough
CT: control target
= control target key end

     0   :  { %vm104_vm0 = vcmask 1041408   ;;  %vm79_vm1 = vcmask 31744   ;;  %s387_s1 = inlined_call_operand.vmem [shape: bf16[4,128], index: 1, kind: input, shape index: {}]   ;;  %s388_s0 = inlined_call_operand.vmem [shape: bf16[128,4], index: 0, kind: input, shape index: {}]   ;;  %s389_s2 = inlined_call_operand.vmem [shape: f32[1,128], index: 2, kind: input, shape index: {}]   ;;  %s390_s3 = inlined_call_operand.vmem [shape: f32[128,128], index: 3, kind: output, shape index: {}]  }
   0x1   :  { %v31_v0 = vld [vmem:[%s387_s1] sm:$0x3]  ;;  %v275_v4 = vld [vmem:[%s388_s0 + $0x8] sm:$0xff]   ;;  %v277_v6 = vld [vmem:[%s388_s0 + $0x10] sm:$0xff]  }
   0x2   :  { %271 = vmatprep.subr.msk.bf16.mxu0 %vm104_vm0, %v31_v0  ;;  %272 = vmatprep.subr.msk.bf16.mxu1 %vm104_vm0, %v31_v0  ;;  %v106_v1 = vsel %vm104_vm0, %v31_v0, 0  ;;  %v273_v2 = vld [vmem:[%s388_s0] sm:$0xff]   ;;  %v276_v5 = vld [vmem:[%s388_s0 + $0x28] sm:$0xff]   ;;  %v278_v7 = vld [vmem:[%s388_s0 + $0x30] sm:$0xff]  }
   0x3   :  { %252 = vmatpush3.bf16.msra.mxu0 %v106_v1  ;;  %270 = vmatpush3.bf16.msra.mxu1 %v106_v1  ;;  %v274_v3 = vld [vmem:[%s388_s0 + $0x20] sm:$0xff]   ;;  %v279_v8 = vld [vmem:[%s388_s0 + $0x18] sm:$0xff]  }
   0x4   :  { %253 = vmatprep.mubr.msk.bf16.mxu0 %vm79_vm1, %v273_v2  ;;  %261 = vmatprep.mubr.msk.bf16.mxu1 %vm79_vm1, %v274_v3  ;;  %v280_v9 = vld [vmem:[%s388_s0 + $0x38] sm:$0xff]   ;;  %v225_v10 = vld [vmem:[%s389_s2] ss:$0 sm:$0xff] }
   0x6   :  { %254 = vmatmul.mubr.msk.bf16.vlgmr.msra.gmra.mrb[0].mxu0 %vm79_vm1, %v275_v4  ;;  %262 = vmatmul.mubr.msk.bf16.vlgmr.msra.gmra.mrb[0].mxu1 %vm79_vm1, %v276_v5 }
   0x7   :  { %257 = vmatprep.mubr.msk.bf16.mxu0 %vm79_vm1, %v277_v6  ;;  %265 = vmatprep.mubr.msk.bf16.mxu1 %vm79_vm1, %v278_v7 }
   0xe   :  { %258 = vmatmul.mubr.msk.bf16.gmra.mrb[4].mxu0 %vm79_vm1, %v279_v8  ;;  %266 = vmatmul.mubr.msk.bf16.gmra.mrb[4].mxu1 %vm79_vm1, %v280_v9 }
  0xd9   :  { %v255_v11 = vpop.f32.mrb[0].mxu0  ;;  %v263_v13 = vpop.f32.mrb[0].mxu1 }
  0xda   :  { %v151_v12 = vadd.f32 %v255_v11, %v225_v10  ;;  %v142_v14 = vpop.f32.mrb[1].mxu0  ;;  %v183_v15 = vadd.f32 %v263_v13, %v225_v10  ;;  %v174_v17 = vpop.f32.mrb[1].mxu1 }
  0xdb   :  { %v143_v16 = vadd.f32 %v225_v10, %v142_v14  ;;  %v256_v18 = vpop.f32.mrb[2].mxu0  ;;  %v175_v19 = vadd.f32 %v225_v10, %v174_v17  ;;  %v264_v21 = vpop.f32.mrb[2].mxu1 }
  0xdc   :  { %207 = vst [vmem:[%s390_s3 + $0x10] sm:$0xff] %v151_v12  ;;  %v154_v20 = vadd.f32 %v256_v18, %v225_v10  ;;  %v145_v22 = vpop.f32.mrb[3].mxu0  ;;  %215 = vst [vmem:[%s390_s3 + $0x50] sm:$0xff] %v183_v15  ;;  %v186_v23 = vadd.f32 %v264_v21, %v225_v10  ;;  %v177_v25 = vpop.f32.mrb[3].mxu1 }
  0xdd   :  { %205 = vst [vmem:[%s390_s3] sm:$0xff] %v143_v16  ;;  %v146_v24 = vadd.f32 %v225_v10, %v145_v22  ;;  %213 = vst [vmem:[%s390_s3 + $0x40] sm:$0xff] %v175_v19  ;;  %v178_v26 = vadd.f32 %v225_v10, %v177_v25 }
  0xde   :  { %208 = vst [vmem:[%s390_s3 + $0x18] sm:$0xff] %v154_v20  ;;  %216 = vst [vmem:[%s390_s3 + $0x58] sm:$0xff] %v186_v23 }
  0xdf   :  { %206 = vst [vmem:[%s390_s3 + $0x8] sm:$0xff] %v146_v24  ;;  %214 = vst [vmem:[%s390_s3 + $0x48] sm:$0xff] %v178_v26 }
  0xe1   :  { %v259_v27 = vpop.f32.mrb[4].mxu0  ;;  %v267_v29 = vpop.f32.mrb[4].mxu1 }
  0xe2   :  { %v167_v28 = vadd.f32 %v259_v27, %v225_v10  ;;  %v158_v30 = vpop.f32.mrb[5].mxu0  ;;  %v199_v31 = vadd.f32 %v267_v29, %v225_v10  ;;  %v190_v33 = vpop.f32.mrb[5].mxu1 }
  0xe3   :  { %v159_v32 = vadd.f32 %v225_v10, %v158_v30  ;;  %v260_v34 = vpop.f32.mrb[6].mxu0  ;;  %v191_v35 = vadd.f32 %v225_v10, %v190_v33  ;;  %v268_v37 = vpop.f32.mrb[6].mxu1 }
  0xe4   :  { %211 = vst [vmem:[%s390_s3 + $0x30] sm:$0xff] %v167_v28  ;;  %v170_v36 = vadd.f32 %v260_v34, %v225_v10  ;;  %v161_v38 = vpop.f32.mrb[7].mxu0  ;;  %219 = vst [vmem:[%s390_s3 + $0x70] sm:$0xff] %v199_v31  ;;  %v202_v39 = vadd.f32 %v268_v37, %v225_v10  ;;  %v193_v41 = vpop.f32.mrb[7].mxu1 }
  0xe5   :  { %209 = vst [vmem:[%s390_s3 + $0x20] sm:$0xff] %v159_v32  ;;  %v162_v40 = vadd.f32 %v225_v10, %v161_v38  ;;  %217 = vst [vmem:[%s390_s3 + $0x60] sm:$0xff] %v191_v35  ;;  %v194_v42 = vadd.f32 %v225_v10, %v193_v41 }
  0xe6   :  { %212 = vst [vmem:[%s390_s3 + $0x38] sm:$0xff] %v170_v36  ;;  %220 = vst [vmem:[%s390_s3 + $0x78] sm:$0xff] %v202_v39 }
  0xe7   :  { %210 = vst [vmem:[%s390_s3 + $0x28] sm:$0xff] %v162_v40  ;;  %218 = vst [vmem:[%s390_s3 + $0x68] sm:$0xff] %v194_v42 }

// kernel: _lambda_.5
= control target key start
LH: loop header
LB: loop body
LE: loop exit
PB: predicated region body
PF: predicated region fallthrough
CT: control target
= control target key end

     0   :  { %vm98_vm0 = vcmask 293888   ;;  %vm123_vm1 = vcmask 1041408   ;;  %s444_s1 = inlined_call_operand.vmem [shape: bf16[36,128], index: 1, kind: input, shape index: {}]   ;;  %s445_s0 = inlined_call_operand.vmem [shape: bf16[128,36], index: 0, kind: input, shape index: {}]   ;;  %s446_s2 = inlined_call_operand.vmem [shape: f32[1,128], index: 2, kind: input, shape index: {}]   ;;  %s447_s3 = inlined_call_operand.vmem [shape: f32[128,128], index: 3, kind: output, shape index: {}]  }
   0x1   :  { %v321_v0 = vld [vmem:[%s444_s1] sm:$0xff]   ;;  %v322_v1 = vld [vmem:[%s444_s1 + $0x8] sm:$0xff]   ;;  %v323_v2 = vld [vmem:[%s444_s1 + $0x10] ss:$0 sps:$4 sm:$0x33]  }
   0x2   :  { %291 = vmatprep.subr.bf16.mxu0 %v321_v0  ;;  %313 = vmatprep.subr.bf16.mxu1 %v321_v0  ;;  %v324_v3 = vld [vmem:[%s445_s0] sm:$0xff]   ;;  %v125_v5 = vsel %vm123_vm1, %v323_v2, 0  ;;  %v326_v6 = vld [vmem:[%s445_s0 + $0x8] sm:$0xff]   ;;  %v328_v8 = vld [vmem:[%s445_s0 + $0x10] sm:$0xff]  }
   0x3   :  { %292 = vmatpush3.bf16.msra.mxu0 %v321_v0  ;;  %316 = vmatpush3.bf16.msra.mxu1 %v321_v0  ;;  %v325_v4 = vld [vmem:[%s445_s0 + $0x20] sm:$0xff]   ;;  %v327_v7 = vld [vmem:[%s445_s0 + $0x28] sm:$0xff]   ;;  %v329_v9 = vld [vmem:[%s445_s0 + $0x30] sm:$0xff]  }
   0x4   :  { %293 = vmatprep.subr.bf16.mxu0 %v322_v1  ;;  %314 = vmatprep.subr.bf16.mxu1 %v322_v1  ;;  %v330_v10 = vld [vmem:[%s445_s0 + $0x18] sm:$0xff]   ;;  %v260_v12 = vld [vmem:[%s446_s2] ss:$0 sm:$0xff] }
   0x5   :  { %297 = vmatprep.mubr.msk.bf16.mxu0 %vm98_vm0, %v324_v3  ;;  %305 = vmatprep.mubr.msk.bf16.mxu1 %vm98_vm0, %v325_v4  ;;  %v331_v11 = vld [vmem:[%s445_s0 + $0x38] sm:$0xff]  }
   0x7   :  { %294 = vmatpush3.bf16.msra.mxu0 %v322_v1  ;;  %317 = vmatpush3.bf16.msra.mxu1 %v322_v1 }
   0x8   :  { %319 = vmatprep.subr.msk.bf16.mxu0 %vm123_vm1, %v323_v2  ;;  %320 = vmatprep.subr.msk.bf16.mxu1 %vm123_vm1, %v323_v2 }
   0xb   :  { %296 = vmatpush3.bf16.msra.mxu0 %v125_v5  ;;  %318 = vmatpush3.bf16.msra.mxu1 %v125_v5 }
   0xe   :  { %298 = vmatmul.mubr.msk.bf16.vlgmr.msra.gmra.mrb[0].mxu0 %vm98_vm0, %v326_v6  ;;  %306 = vmatmul.mubr.msk.bf16.vlgmr.msra.gmra.mrb[0].mxu1 %vm98_vm0, %v327_v7 }
   0xf   :  { %301 = vmatprep.mubr.msk.bf16.mxu0 %vm98_vm0, %v328_v8  ;;  %309 = vmatprep.mubr.msk.bf16.mxu1 %vm98_vm0, %v329_v9 }
  0x16   :  { %302 = vmatmul.mubr.msk.bf16.gmra.mrb[4].mxu0 %vm98_vm0, %v330_v10  ;;  %310 = vmatmul.mubr.msk.bf16.gmra.mrb[4].mxu1 %vm98_vm0, %v331_v11 }
  0xe1   :  { %v299_v13 = vpop.f32.mrb[0].mxu0  ;;  %v307_v14 = vpop.f32.mrb[0].mxu1 }
  0xe2   :  { %v170_v15 = vadd.f32 %v299_v13, %v260_v12  ;;  %v202_v16 = vadd.f32 %v307_v14, %v260_v12  ;;  %v161_v17 = vpop.f32.mrb[1].mxu0  ;;  %v193_v18 = vpop.f32.mrb[1].mxu1 }
  0xe3   :  { %v162_v19 = vadd.f32 %v260_v12, %v161_v17  ;;  %v194_v20 = vadd.f32 %v260_v12, %v193_v18  ;;  %v300_v21 = vpop.f32.mrb[2].mxu0  ;;  %v308_v22 = vpop.f32.mrb[2].mxu1 }
  0xe4   :  { %v226_v23 = vmax.f32 %v170_v15, 0.0  ;;  %v234_v24 = vmax.f32 %v202_v16, 0.0  ;;  %v173_v25 = vadd.f32 %v300_v21, %v260_v12  ;;  %v205_v26 = vadd.f32 %v308_v22, %v260_v12  ;;  %v164_v27 = vpop.f32.mrb[3].mxu0  ;;  %v196_v28 = vpop.f32.mrb[3].mxu1 }
  0xe5   :  { %v224_v29 = vmax.f32 %v162_v19, 0.0  ;;  %v232_v30 = vmax.f32 %v194_v20, 0.0  ;;  %v165_v31 = vadd.f32 %v260_v12, %v164_v27  ;;  %v197_v32 = vadd.f32 %v260_v12, %v196_v28 }
  0xe6   :  { %242 = vst [vmem:[%s447_s3 + $0x10] sm:$0xff] %v226_v23  ;;  %250 = vst [vmem:[%s447_s3 + $0x50] sm:$0xff] %v234_v24  ;;  %v227_v33 = vmax.f32 %v173_v25, 0.0  ;;  %v235_v34 = vmax.f32 %v205_v26, 0.0 }
  0xe7   :  { %240 = vst [vmem:[%s447_s3] sm:$0xff] %v224_v29  ;;  %248 = vst [vmem:[%s447_s3 + $0x40] sm:$0xff] %v232_v30  ;;  %v225_v35 = vmax.f32 %v165_v31, 0.0  ;;  %v233_v36 = vmax.f32 %v197_v32, 0.0 }
  0xe8   :  { %243 = vst [vmem:[%s447_s3 + $0x18] sm:$0xff] %v227_v33  ;;  %251 = vst [vmem:[%s447_s3 + $0x58] sm:$0xff] %v235_v34 }
  0xe9   :  { %241 = vst [vmem:[%s447_s3 + $0x8] sm:$0xff] %v225_v35  ;;  %249 = vst [vmem:[%s447_s3 + $0x48] sm:$0xff] %v233_v36  ;;  %v303_v37 = vpop.f32.mrb[4].mxu0  ;;  %v311_v38 = vpop.f32.mrb[4].mxu1 }
  0xea   :  { %v186_v39 = vadd.f32 %v303_v37, %v260_v12  ;;  %v218_v40 = vadd.f32 %v311_v38, %v260_v12  ;;  %v177_v41 = vpop.f32.mrb[5].mxu0  ;;  %v209_v42 = vpop.f32.mrb[5].mxu1 }
  0xeb   :  { %v178_v43 = vadd.f32 %v260_v12, %v177_v41  ;;  %v210_v44 = vadd.f32 %v260_v12, %v209_v42  ;;  %v304_v45 = vpop.f32.mrb[6].mxu0  ;;  %v312_v46 = vpop.f32.mrb[6].mxu1 }
  0xec   :  { %v230_v47 = vmax.f32 %v186_v39, 0.0  ;;  %v238_v48 = vmax.f32 %v218_v40, 0.0  ;;  %v189_v49 = vadd.f32 %v304_v45, %v260_v12  ;;  %v221_v50 = vadd.f32 %v312_v46, %v260_v12  ;;  %v180_v51 = vpop.f32.mrb[7].mxu0  ;;  %v212_v52 = vpop.f32.mrb[7].mxu1 }
  0xed   :  { %v228_v53 = vmax.f32 %v178_v43, 0.0  ;;  %v236_v54 = vmax.f32 %v210_v44, 0.0  ;;  %v181_v55 = vadd.f32 %v260_v12, %v180_v51  ;;  %v213_v56 = vadd.f32 %v260_v12, %v212_v52 }
  0xee   :  { %246 = vst [vmem:[%s447_s3 + $0x30] sm:$0xff] %v230_v47  ;;  %254 = vst [vmem:[%s447_s3 + $0x70] sm:$0xff] %v238_v48  ;;  %v231_v57 = vmax.f32 %v189_v49, 0.0  ;;  %v239_v58 = vmax.f32 %v221_v50, 0.0 }
  0xef   :  { %244 = vst [vmem:[%s447_s3 + $0x20] sm:$0xff] %v228_v53  ;;  %252 = vst [vmem:[%s447_s3 + $0x60] sm:$0xff] %v236_v54  ;;  %v229_v59 = vmax.f32 %v181_v55, 0.0  ;;  %v237_v60 = vmax.f32 %v213_v56, 0.0 }
  0xf0   :  { %247 = vst [vmem:[%s447_s3 + $0x38] sm:$0xff] %v231_v57  ;;  %255 = vst [vmem:[%s447_s3 + $0x78] sm:$0xff] %v239_v58 }
  0xf1   :  { %245 = vst [vmem:[%s447_s3 + $0x28] sm:$0xff] %v229_v59  ;;  %253 = vst [vmem:[%s447_s3 + $0x68] sm:$0xff] %v237_v60 }

// kernel: _lambda_.7
= control target key start
LH: loop header
LB: loop body
LE: loop exit
PB: predicated region body
PF: predicated region fallthrough
CT: control target
= control target key end

     0   :  { %vm117_vm0 = vcmask 588800   ;;  %vm142_vm1 = vcmask 1043456   ;;  %s586_s1 = inlined_call_operand.vmem [shape: bf16[72,128], index: 1, kind: input, shape index: {}]   ;;  %s587_s0 = inlined_call_operand.vmem [shape: bf16[128,72], index: 0, kind: input, shape index: {}]   ;;  %s588_s2 = inlined_call_operand.vmem [shape: f32[1,128], index: 2, kind: input, shape index: {}]   ;;  %s589_s3 = inlined_call_operand.vmem [shape: f32[128,128], index: 3, kind: input, shape index: {}]   ;;  %s590_s4 = inlined_call_operand.vmem [shape: f32[128,128], index: 4, kind: output, shape index: {}]  }
   0x1   :  { %v384_v0 = vld [vmem:[%s586_s1] sm:$0xff]   ;;  %v385_v1 = vld [vmem:[%s586_s1 + $0x8] sm:$0xff]   ;;  %v386_v2 = vld [vmem:[%s586_s1 + $0x10] sm:$0xff]  }
   0x2   :  { %346 = vmatprep.subr.bf16.mxu0 %v384_v0  ;;  %372 = vmatprep.subr.bf16.mxu1 %v384_v0  ;;  %v389_v3 = vld [vmem:[%s587_s0] sm:$0xff]   ;;  %v387_v5 = vld [vmem:[%s586_s1 + $0x18] sm:$0xff]   ;;  %v391_v8 = vld [vmem:[%s587_s0 + $0x8] sm:$0xff]  }
   0x3   :  { %347 = vmatpush3.bf16.msra.mxu0 %v384_v0  ;;  %377 = vmatpush3.bf16.msra.mxu1 %v384_v0  ;;  %v390_v4 = vld [vmem:[%s587_s0 + $0x20] sm:$0xff]   ;;  %v392_v9 = vld [vmem:[%s587_s0 + $0x28] sm:$0xff]   ;;  %v393_v10 = vld [vmem:[%s587_s0 + $0x10] sm:$0xff]  }
   0x4   :  { %348 = vmatprep.subr.bf16.mxu0 %v385_v1  ;;  %373 = vmatprep.subr.bf16.mxu1 %v385_v1  ;;  %v388_v6 = vld [vmem:[%s586_s1 + $0x20] ss:$0 sps:$4 sm:$0xff]   ;;  %v394_v11 = vld [vmem:[%s587_s0 + $0x30] sm:$0xff]   ;;  %v395_v12 = vld [vmem:[%s587_s0 + $0x18] sm:$0xff]  }
   0x5   :  { %356 = vmatprep.mubr.msk.bf16.mxu0 %vm117_vm0, %v389_v3  ;;  %364 = vmatprep.mubr.msk.bf16.mxu1 %vm117_vm0, %v390_v4  ;;  %v144_v7 = vsel %vm142_vm1, %v388_v6, 0  ;;  %v396_v13 = vld [vmem:[%s587_s0 + $0x38] sm:$0xff]   ;;  %v472_v14 = vld [vmem:[%s588_s2] ss:$0 sm:$0xff]  ;;  %v245_v16 = vld [vmem:[%s589_s3 + $0x10] sm:$0xff] }
   0x6   :  { %v253_v18 = vld [vmem:[%s589_s3 + $0x50] sm:$0xff]  ;;  %v243_v22 = vld [vmem:[%s589_s3] sm:$0xff]  ;;  %v246_v28 = vld [vmem:[%s589_s3 + $0x18] sm:$0xff] }
   0x7   :  { %349 = vmatpush3.bf16.msra.mxu0 %v385_v1  ;;  %378 = vmatpush3.bf16.msra.mxu1 %v385_v1  ;;  %v251_v24 = vld [vmem:[%s589_s3 + $0x40] sm:$0xff]  ;;  %v254_v30 = vld [vmem:[%s589_s3 + $0x58] sm:$0xff]  ;;  %v244_v36 = vld [vmem:[%s589_s3 + $0x8] sm:$0xff] }
   0x8   :  { %350 = vmatprep.subr.bf16.mxu0 %v386_v2  ;;  %374 = vmatprep.subr.bf16.mxu1 %v386_v2  ;;  %v252_v38 = vld [vmem:[%s589_s3 + $0x48] sm:$0xff]  ;;  %v249_v56 = vld [vmem:[%s589_s3 + $0x30] sm:$0xff]  ;;  %v247_v62 = vld [vmem:[%s589_s3 + $0x20] sm:$0xff] }
   0x9   :  { %v257_v58 = vld [vmem:[%s589_s3 + $0x70] sm:$0xff]  ;;  %v255_v0 = vld [vmem:[%s589_s3 + $0x60] sm:$0xff]  ;;  %v250_v4 = vld [vmem:[%s589_s3 + $0x38] sm:$0xff] }
   0xb   :  { %351 = vmatpush3.bf16.msra.mxu0 %v386_v2  ;;  %379 = vmatpush3.bf16.msra.mxu1 %v386_v2 }
   0xc   :  { %352 = vmatprep.subr.bf16.mxu0 %v387_v5  ;;  %375 = vmatprep.subr.bf16.mxu1 %v387_v5 }
   0xf   :  { %353 = vmatpush3.bf16.msra.mxu0 %v387_v5  ;;  %380 = vmatpush3.bf16.msra.mxu1 %v387_v5 }
  0x10   :  { %382 = vmatprep.subr.msk.bf16.mxu0 %vm142_vm1, %v388_v6  ;;  %383 = vmatprep.subr.msk.bf16.mxu1 %vm142_vm1, %v388_v6  ;;  %v258_v6 = vld [vmem:[%s589_s3 + $0x78] sm:$0xff] }
  0x13   :  { %355 = vmatpush3.bf16.msra.mxu0 %v144_v7  ;;  %381 = vmatpush3.bf16.msra.mxu1 %v144_v7 }
  0x16   :  { %357 = vmatmul.mubr.msk.bf16.vlgmr.msra.gmra.mrb[0].mxu0 %vm117_vm0, %v391_v8  ;;  %365 = vmatmul.mubr.msk.bf16.vlgmr.msra.gmra.mrb[0].mxu1 %vm117_vm0, %v392_v9 }
  0x17   :  { %360 = vmatprep.mubr.msk.bf16.mxu0 %vm117_vm0, %v393_v10  ;;  %368 = vmatprep.mubr.msk.bf16.mxu1 %vm117_vm0, %v394_v11 }
  0x1e   :  { %361 = vmatmul.mubr.msk.bf16.gmra.mrb[4].mxu0 %vm117_vm0, %v395_v12  ;;  %369 = vmatmul.mubr.msk.bf16.gmra.mrb[4].mxu1 %vm117_vm0, %v396_v13  ;;  %v248_v12 = vld [vmem:[%s589_s3 + $0x28] sm:$0xff] }
  0xe9   :  { %v358_v15 = vpop.f32.mrb[0].mxu0  ;;  %v366_v17 = vpop.f32.mrb[0].mxu1 }
  0xea   :  { %v189_v19 = vadd.f32 %v358_v15, %v472_v14  ;;  %v221_v20 = vadd.f32 %v366_v17, %v472_v14  ;;  %v180_v21 = vpop.f32.mrb[1].mxu0  ;;  %v212_v23 = vpop.f32.mrb[1].mxu1  ;;  %v256_v15 = vld [vmem:[%s589_s3 + $0x68] sm:$0xff] }
  0xeb   :  { %v181_v25 = vadd.f32 %v472_v14, %v180_v21  ;;  %v213_v26 = vadd.f32 %v472_v14, %v212_v23  ;;  %v359_v27 = vpop.f32.mrb[2].mxu0  ;;  %v367_v29 = vpop.f32.mrb[2].mxu1 }
  0xec   :  { %v261_v31 = vadd.f32 %v245_v16, %v189_v19  ;;  %v269_v32 = vadd.f32 %v253_v18, %v221_v20  ;;  %v192_v33 = vadd.f32 %v359_v27, %v472_v14  ;;  %v224_v34 = vadd.f32 %v367_v29, %v472_v14  ;;  %v183_v35 = vpop.f32.mrb[3].mxu0  ;;  %v215_v37 = vpop.f32.mrb[3].mxu1 }
  0xed   :  { %v259_v39 = vadd.f32 %v243_v22, %v181_v25  ;;  %v267_v40 = vadd.f32 %v251_v24, %v213_v26  ;;  %v184_v41 = vadd.f32 %v472_v14, %v183_v35  ;;  %v216_v42 = vadd.f32 %v472_v14, %v215_v37 }
  0xee   :  { %v277_v43 = vmax.f32 %v261_v31, 0.0  ;;  %v285_v44 = vmax.f32 %v269_v32, 0.0  ;;  %v262_v45 = vadd.f32 %v246_v28, %v192_v33  ;;  %v270_v46 = vadd.f32 %v254_v30, %v224_v34 }
  0xef   :  { %v275_v47 = vmax.f32 %v259_v39, 0.0  ;;  %v283_v48 = vmax.f32 %v267_v40, 0.0  ;;  %v260_v49 = vadd.f32 %v244_v36, %v184_v41  ;;  %v268_v50 = vadd.f32 %v252_v38, %v216_v42 }
  0xf0   :  { %293 = vst [vmem:[%s590_s4 + $0x10] sm:$0xff] %v277_v43  ;;  %301 = vst [vmem:[%s590_s4 + $0x50] sm:$0xff] %v285_v44  ;;  %v278_v51 = vmax.f32 %v262_v45, 0.0  ;;  %v286_v52 = vmax.f32 %v270_v46, 0.0 }
  0xf1   :  { %291 = vst [vmem:[%s590_s4] sm:$0xff] %v275_v47  ;;  %299 = vst [vmem:[%s590_s4 + $0x40] sm:$0xff] %v283_v48  ;;  %v276_v53 = vmax.f32 %v260_v49, 0.0  ;;  %v284_v54 = vmax.f32 %v268_v50, 0.0  ;;  %v362_v55 = vpop.f32.mrb[4].mxu0  ;;  %v370_v57 = vpop.f32.mrb[4].mxu1 }
  0xf2   :  { %294 = vst [vmem:[%s590_s4 + $0x18] sm:$0xff] %v278_v51  ;;  %302 = vst [vmem:[%s590_s4 + $0x58] sm:$0xff] %v286_v52  ;;  %v205_v59 = vadd.f32 %v362_v55, %v472_v14  ;;  %v237_v60 = vadd.f32 %v370_v57, %v472_v14  ;;  %v196_v61 = vpop.f32.mrb[5].mxu0  ;;  %v228_v63 = vpop.f32.mrb[5].mxu1 }
  0xf3   :  { %292 = vst [vmem:[%s590_s4 + $0x8] sm:$0xff] %v276_v53  ;;  %300 = vst [vmem:[%s590_s4 + $0x48] sm:$0xff] %v284_v54  ;;  %v197_v1 = vadd.f32 %v472_v14, %v196_v61  ;;  %v229_v2 = vadd.f32 %v472_v14, %v228_v63  ;;  %v363_v3 = vpop.f32.mrb[6].mxu0  ;;  %v371_v5 = vpop.f32.mrb[6].mxu1 }
  0xf4   :  { %v265_v7 = vadd.f32 %v249_v56, %v205_v59  ;;  %v273_v8 = vadd.f32 %v257_v58, %v237_v60  ;;  %v208_v9 = vadd.f32 %v363_v3, %v472_v14  ;;  %v240_v10 = vadd.f32 %v371_v5, %v472_v14  ;;  %v199_v11 = vpop.f32.mrb[7].mxu0  ;;  %v231_v13 = vpop.f32.mrb[7].mxu1 }
  0xf5   :  { %v263_v16 = vadd.f32 %v247_v62, %v197_v1  ;;  %v271_v17 = vadd.f32 %v255_v0, %v229_v2  ;;  %v200_v18 = vadd.f32 %v472_v14, %v199_v11  ;;  %v232_v19 = vadd.f32 %v472_v14, %v231_v13 }
  0xf6   :  { %v281_v20 = vmax.f32 %v265_v7, 0.0  ;;  %v289_v21 = vmax.f32 %v273_v8, 0.0  ;;  %v266_v22 = vadd.f32 %v250_v4, %v208_v9  ;;  %v274_v23 = vadd.f32 %v258_v6, %v240_v10 }
  0xf7   :  { %v279_v24 = vmax.f32 %v263_v16, 0.0  ;;  %v287_v25 = vmax.f32 %v271_v17, 0.0  ;;  %v264_v26 = vadd.f32 %v248_v12, %v200_v18  ;;  %v272_v27 = vadd.f32 %v256_v15, %v232_v19 }
  0xf8   :  { %297 = vst [vmem:[%s590_s4 + $0x30] sm:$0xff] %v281_v20  ;;  %305 = vst [vmem:[%s590_s4 + $0x70] sm:$0xff] %v289_v21  ;;  %v282_v28 = vmax.f32 %v266_v22, 0.0  ;;  %v290_v29 = vmax.f32 %v274_v23, 0.0 }
  0xf9   :  { %295 = vst [vmem:[%s590_s4 + $0x20] sm:$0xff] %v279_v24  ;;  %303 = vst [vmem:[%s590_s4 + $0x60] sm:$0xff] %v287_v25  ;;  %v280_v14 = vmax.f32 %v264_v26, 0.0  ;;  %v288_v30 = vmax.f32 %v272_v27, 0.0 }
  0xfa   :  { %298 = vst [vmem:[%s590_s4 + $0x38] sm:$0xff] %v282_v28  ;;  %306 = vst [vmem:[%s590_s4 + $0x78] sm:$0xff] %v290_v29 }
  0xfb   :  { %296 = vst [vmem:[%s590_s4 + $0x28] sm:$0xff] %v280_v14  ;;  %304 = vst [vmem:[%s590_s4 + $0x68] sm:$0xff] %v288_v30 }

// kernel: _lambda_.8
= control target key start
LH: loop header
LB: loop body
LE: loop exit
PB: predicated region body
PF: predicated region fallthrough
CT: control target
= control target key end

     0   :  { %vm114_vm0 = vcmask 588800   ;;  %vm139_vm1 = vcmask 1043456   ;;  %s480_s1 = inlined_call_operand.vmem [shape: bf16[72,128], index: 1, kind: input, shape index: {}]   ;;  %s481_s0 = inlined_call_operand.vmem [shape: bf16[128,72], index: 0, kind: input, shape index: {}]   ;;  %s482_s2 = inlined_call_operand.vmem [shape: f32[1,128], index: 2, kind: input, shape index: {}]   ;;  %s483_s3 = inlined_call_operand.vmem [shape: f32[128,128], index: 3, kind: output, shape index: {}]  }
   0x1   :  { %v349_v0 = vld [vmem:[%s480_s1] sm:$0xff]   ;;  %v350_v1 = vld [vmem:[%s480_s1 + $0x8] sm:$0xff]   ;;  %v351_v2 = vld [vmem:[%s480_s1 + $0x10] sm:$0xff]  }
   0x2   :  { %311 = vmatprep.subr.bf16.mxu0 %v349_v0  ;;  %337 = vmatprep.subr.bf16.mxu1 %v349_v0  ;;  %v354_v3 = vld [vmem:[%s481_s0] sm:$0xff]   ;;  %v352_v5 = vld [vmem:[%s480_s1 + $0x18] sm:$0xff]   ;;  %v356_v8 = vld [vmem:[%s481_s0 + $0x8] sm:$0xff]  }
   0x3   :  { %312 = vmatpush3.bf16.msra.mxu0 %v349_v0  ;;  %342 = vmatpush3.bf16.msra.mxu1 %v349_v0  ;;  %v355_v4 = vld [vmem:[%s481_s0 + $0x20] sm:$0xff]   ;;  %v357_v9 = vld [vmem:[%s481_s0 + $0x28] sm:$0xff]   ;;  %v358_v10 = vld [vmem:[%s481_s0 + $0x10] sm:$0xff]  }
   0x4   :  { %313 = vmatprep.subr.bf16.mxu0 %v350_v1  ;;  %338 = vmatprep.subr.bf16.mxu1 %v350_v1  ;;  %v353_v6 = vld [vmem:[%s480_s1 + $0x20] ss:$0 sps:$4 sm:$0xff]   ;;  %v359_v11 = vld [vmem:[%s481_s0 + $0x30] sm:$0xff]   ;;  %v360_v12 = vld [vmem:[%s481_s0 + $0x18] sm:$0xff]  }
   0x5   :  { %321 = vmatprep.mubr.msk.bf16.mxu0 %vm114_vm0, %v354_v3  ;;  %329 = vmatprep.mubr.msk.bf16.mxu1 %vm114_vm0, %v355_v4  ;;  %v141_v7 = vsel %vm139_vm1, %v353_v6, 0  ;;  %v361_v13 = vld [vmem:[%s481_s0 + $0x38] sm:$0xff]   ;;  %v276_v14 = vld [vmem:[%s482_s2] ss:$0 sm:$0xff] }
   0x7   :  { %314 = vmatpush3.bf16.msra.mxu0 %v350_v1  ;;  %343 = vmatpush3.bf16.msra.mxu1 %v350_v1 }
   0x8   :  { %315 = vmatprep.subr.bf16.mxu0 %v351_v2  ;;  %339 = vmatprep.subr.bf16.mxu1 %v351_v2 }
   0xb   :  { %316 = vmatpush3.bf16.msra.mxu0 %v351_v2  ;;  %344 = vmatpush3.bf16.msra.mxu1 %v351_v2 }
   0xc   :  { %317 = vmatprep.subr.bf16.mxu0 %v352_v5  ;;  %340 = vmatprep.subr.bf16.mxu1 %v352_v5 }
   0xf   :  { %318 = vmatpush3.bf16.msra.mxu0 %v352_v5  ;;  %345 = vmatpush3.bf16.msra.mxu1 %v352_v5 }
  0x10   :  { %347 = vmatprep.subr.msk.bf16.mxu0 %vm139_vm1, %v353_v6  ;;  %348 = vmatprep.subr.msk.bf16.mxu1 %vm139_vm1, %v353_v6 }
  0x13   :  { %320 = vmatpush3.bf16.msra.mxu0 %v141_v7  ;;  %346 = vmatpush3.bf16.msra.mxu1 %v141_v7 }
  0x16   :  { %322 = vmatmul.mubr.msk.bf16.vlgmr.msra.gmra.mrb[0].mxu0 %vm114_vm0, %v356_v8  ;;  %330 = vmatmul.mubr.msk.bf16.vlgmr.msra.gmra.mrb[0].mxu1 %vm114_vm0, %v357_v9 }
  0x17   :  { %325 = vmatprep.mubr.msk.bf16.mxu0 %vm114_vm0, %v358_v10  ;;  %333 = vmatprep.mubr.msk.bf16.mxu1 %vm114_vm0, %v359_v11 }
  0x1e   :  { %326 = vmatmul.mubr.msk.bf16.gmra.mrb[4].mxu0 %vm114_vm0, %v360_v12  ;;  %334 = vmatmul.mubr.msk.bf16.gmra.mrb[4].mxu1 %vm114_vm0, %v361_v13 }
  0xe9   :  { %v323_v15 = vpop.f32.mrb[0].mxu0  ;;  %v331_v16 = vpop.f32.mrb[0].mxu1 }
  0xea   :  { %v186_v17 = vadd.f32 %v323_v15, %v276_v14  ;;  %v218_v18 = vadd.f32 %v331_v16, %v276_v14  ;;  %v177_v19 = vpop.f32.mrb[1].mxu0  ;;  %v209_v20 = vpop.f32.mrb[1].mxu1 }
  0xeb   :  { %v178_v21 = vadd.f32 %v276_v14, %v177_v19  ;;  %v210_v22 = vadd.f32 %v276_v14, %v209_v20  ;;  %v324_v23 = vpop.f32.mrb[2].mxu0  ;;  %v332_v24 = vpop.f32.mrb[2].mxu1 }
  0xec   :  { %v242_v25 = vmax.f32 %v186_v17, 0.0  ;;  %v250_v26 = vmax.f32 %v218_v18, 0.0  ;;  %v189_v27 = vadd.f32 %v324_v23, %v276_v14  ;;  %v221_v28 = vadd.f32 %v332_v24, %v276_v14  ;;  %v180_v29 = vpop.f32.mrb[3].mxu0  ;;  %v212_v30 = vpop.f32.mrb[3].mxu1 }
  0xed   :  { %v240_v31 = vmax.f32 %v178_v21, 0.0  ;;  %v248_v32 = vmax.f32 %v210_v22, 0.0  ;;  %v181_v33 = vadd.f32 %v276_v14, %v180_v29  ;;  %v213_v34 = vadd.f32 %v276_v14, %v212_v30 }
  0xee   :  { %258 = vst [vmem:[%s483_s3 + $0x10] sm:$0xff] %v242_v25  ;;  %266 = vst [vmem:[%s483_s3 + $0x50] sm:$0xff] %v250_v26  ;;  %v243_v35 = vmax.f32 %v189_v27, 0.0  ;;  %v251_v36 = vmax.f32 %v221_v28, 0.0 }
  0xef   :  { %256 = vst [vmem:[%s483_s3] sm:$0xff] %v240_v31  ;;  %264 = vst [vmem:[%s483_s3 + $0x40] sm:$0xff] %v248_v32  ;;  %v241_v37 = vmax.f32 %v181_v33, 0.0  ;;  %v249_v38 = vmax.f32 %v213_v34, 0.0 }
  0xf0   :  { %259 = vst [vmem:[%s483_s3 + $0x18] sm:$0xff] %v243_v35  ;;  %267 = vst [vmem:[%s483_s3 + $0x58] sm:$0xff] %v251_v36 }
  0xf1   :  { %257 = vst [vmem:[%s483_s3 + $0x8] sm:$0xff] %v241_v37  ;;  %265 = vst [vmem:[%s483_s3 + $0x48] sm:$0xff] %v249_v38  ;;  %v327_v39 = vpop.f32.mrb[4].mxu0  ;;  %v335_v40 = vpop.f32.mrb[4].mxu1 }
  0xf2   :  { %v202_v41 = vadd.f32 %v327_v39, %v276_v14  ;;  %v234_v42 = vadd.f32 %v335_v40, %v276_v14  ;;  %v193_v43 = vpop.f32.mrb[5].mxu0  ;;  %v225_v44 = vpop.f32.mrb[5].mxu1 }
  0xf3   :  { %v194_v45 = vadd.f32 %v276_v14, %v193_v43  ;;  %v226_v46 = vadd.f32 %v276_v14, %v225_v44  ;;  %v328_v47 = vpop.f32.mrb[6].mxu0  ;;  %v336_v48 = vpop.f32.mrb[6].mxu1 }
  0xf4   :  { %v246_v49 = vmax.f32 %v202_v41, 0.0  ;;  %v254_v50 = vmax.f32 %v234_v42, 0.0  ;;  %v205_v51 = vadd.f32 %v328_v47, %v276_v14  ;;  %v237_v52 = vadd.f32 %v336_v48, %v276_v14  ;;  %v196_v53 = vpop.f32.mrb[7].mxu0  ;;  %v228_v54 = vpop.f32.mrb[7].mxu1 }
  0xf5   :  { %v244_v55 = vmax.f32 %v194_v45, 0.0  ;;  %v252_v56 = vmax.f32 %v226_v46, 0.0  ;;  %v197_v57 = vadd.f32 %v276_v14, %v196_v53  ;;  %v229_v58 = vadd.f32 %v276_v14, %v228_v54 }
  0xf6   :  { %262 = vst [vmem:[%s483_s3 + $0x30] sm:$0xff] %v246_v49  ;;  %270 = vst [vmem:[%s483_s3 + $0x70] sm:$0xff] %v254_v50  ;;  %v247_v59 = vmax.f32 %v205_v51, 0.0  ;;  %v255_v60 = vmax.f32 %v237_v52, 0.0 }
  0xf7   :  { %260 = vst [vmem:[%s483_s3 + $0x20] sm:$0xff] %v244_v55  ;;  %268 = vst [vmem:[%s483_s3 + $0x60] sm:$0xff] %v252_v56  ;;  %v245_v61 = vmax.f32 %v197_v57, 0.0  ;;  %v253_v62 = vmax.f32 %v229_v58, 0.0 }
  0xf8   :  { %263 = vst [vmem:[%s483_s3 + $0x38] sm:$0xff] %v247_v59  ;;  %271 = vst [vmem:[%s483_s3 + $0x78] sm:$0xff] %v255_v60 }
  0xf9   :  { %261 = vst [vmem:[%s483_s3 + $0x28] sm:$0xff] %v245_v61  ;;  %269 = vst [vmem:[%s483_s3 + $0x68] sm:$0xff] %v253_v62 }

</bundles_post_ra>
